<compile_context>
chip_gen: v7x
topology: tpu7x:2x2x1
jax: 0.10.0
libtpu: 0.0.40
codegen_flags: <defaults>
</compile_context>

<pallas_src>
import math
from functools import partial

import jax
import jax.numpy as jnp
from jax.experimental import pallas as pl
from jax.experimental.pallas import tpu as pltpu

# ---------------- config (small, deterministic) ----------------
B = 2          # batch
T = 8          # sequence length
N_EMBD = 32    # C
N_HEAD = 4
HEAD_SIZE = N_EMBD // N_HEAD          # 8
ROTARY_PCT = 0.5
N_ELEM = int(ROTARY_PCT * HEAD_SIZE)  # 4
BLOCK_SIZE = 16                       # rope cache length
PARALLEL_RESIDUAL = True
LN_EPS = 1e-5
HIDDEN = 4 * N_EMBD                   # 128


# ---------------- rope cache (matches build_rope_cache) ----------------
def build_rope_cache(seq_len: int, n_elem: int, base: int = 10000):
    theta = 1.0 / base ** (jnp.arange(0, n_elem, 2, dtype=jnp.float32) / n_elem)
    seq_idx = jnp.arange(seq_len, dtype=jnp.float32)
    idx_theta = jnp.outer(seq_idx, theta)                     # (seq, n_elem//2)
    idx_theta = jnp.concatenate([idx_theta, idx_theta], -1)   # .repeat(1, 2)
    return jnp.cos(idx_theta), jnp.sin(idx_theta)             # (seq, n_elem)


# ---------------- Pallas kernel ----------------
def block_kernel(x_ref, small_ref, rope_ref, mask_ref, blkm_ref,
                 wqkv_ref, wrot_ref, projw_ref, fcw_ref, mlpw_ref,
                 o_ref, *, n_head: int, parallel_residual: bool):
    f32 = jnp.float32
    bf16 = jnp.bfloat16

    x = x_ref[...]                          # (BT, C) f32
    bt, c = x.shape

    # packed small params: (8, 4C)
    small = small_ref[...]
    ln1w, ln1b = small[0:1, :c], small[1:2, :c]
    ln2w, ln2b = small[2:3, :c], small[3:4, :c]
    projb, mlpb = small[4:5, :c], small[5:6, :c]
    fcb = small[6:7, :]                     # (1, 4C)

    # packed rope constants: rows [cos | sin | pre-roped bias], each (BT, 3C)
    rope = rope_ref[...]
    cosm = rope[0:bt, :]
    sinm = rope[bt:2 * bt, :]
    bias_roped = rope[2 * bt:3 * bt, :]

    # ---- LayerNorm (stats shared by norm_1 / norm_2 in the parallel path) ----
    def normalize(v):
        mu = jnp.mean(v, axis=-1, keepdims=True)
        vc = v - mu
        var = jnp.mean(vc * vc, axis=-1, keepdims=True)
        return vc * jax.lax.rsqrt(var + LN_EPS)

    xhat = normalize(x)
    h1 = xhat * ln1w + ln1b
    h1b = h1.astype(bf16)

    # ---- fused QKV projections (2 matmuls) + RoPE as a single FMA ----
    # wqkv = [Wq*scale | Wk | Wv], wrot = [Wq*scale@R | Wk@R | 0]; biases are
    # pre-roped host-side into bias_roped.  V columns have cos=1 / sin=0.
    mm_a = jnp.dot(h1b, wqkv_ref[...], preferred_element_type=f32)   # (BT, 3C)
    mm_b = jnp.dot(h1b, wrot_ref[...], preferred_element_type=f32)   # (BT, 3C)
    qkv = mm_a * cosm + mm_b * sinm + bias_roped                     # (BT, 3C)

    q = qkv[:, :c].astype(bf16)             # (BT, C)  head-major
    k = qkv[:, c:2 * c]
    v = qkv[:, 2 * c:]

    # ---- lane-packed multi-head attention (no per-head loop) ----
    blkm = blkm_ref[...]                    # (H*BT, C) bf16 0/1 head-block mask
    k_blk = jnp.tile(k.astype(bf16), (n_head, 1)) * blkm   # (H*BT, C)
    v_blk = jnp.tile(v.astype(bf16), (n_head, 1)) * blkm   # (H*BT, C)

    # per-head scores packed along lanes: s[:, h*BT:(h+1)*BT] = q_h @ k_h^T
    s = jax.lax.dot_general(q, k_blk, (((1,), (1,)), ((), ())),
                            preferred_element_type=f32)     # (BT, H*BT)
    s = s + mask_ref[...]                   # additive causal+batch mask (f32)
    # shared row-max is a valid softmax shift (per-head sums taken below)
    s = s - jnp.max(s, axis=-1, keepdims=True)
    p = jnp.exp(s).astype(bf16)             # (BT, H*BT)

    # unnormalized PV and per-head denominators (broadcast over head lanes)
    y_un = jnp.dot(p, v_blk, preferred_element_type=f32)    # (BT, C)
    den = jnp.dot(p, blkm, preferred_element_type=f32)      # (BT, C)
    y = y_un * pl.reciprocal(den, approx=True)

    attn_out = jnp.dot(y.astype(bf16), projw_ref[...],
                       preferred_element_type=f32) + projb  # (BT, C)

    # ---- MLP ----
    def mlp(inp):
        hmid = jnp.dot(inp.astype(bf16), fcw_ref[...],
                       preferred_element_type=f32) + fcb
        g = 0.5 * hmid * (1.0 + jax.lax.erf(hmid * (1.0 / math.sqrt(2.0))))
        return jnp.dot(g.astype(bf16), mlpw_ref[...],
                       preferred_element_type=f32) + mlpb

    if parallel_residual:
        h2 = xhat * ln2w + ln2b             # reuse shared LN statistics
        out = x + attn_out + mlp(h2)
    else:
        x1 = x + attn_out
        h2 = normalize(x1) * ln2w + ln2b
        out = x1 + mlp(h2)

    o_ref[...] = out.astype(o_ref.dtype)


# ---------------- host-side parameter preparation (layout plumbing) ----------------
def prepare_block_params(params, cos, sin, *, batch, seq, n_head, n_elem):
    (ln1w, ln1b, ln2w, ln2b, attnw, attnb, projw, projb,
     fcw, fcb, mlpw, mlpb) = params
    c = attnw.shape[0]
    hs = c // n_head
    half = n_elem // 2
    scale = 1.0 / math.sqrt(hs)
    bt = batch * seq
    hidden = fcw.shape[1]
    f32, bf16 = jnp.float32, jnp.bfloat16

    # regroup per-head-interleaved qkv columns into head-major Q | K | V slabs
    idx_q = jnp.array([h * 3 * hs + d for h in range(n_head) for d in range(hs)],
                      dtype=jnp.int32)
    idx_k = idx_q + hs
    idx_v = idx_q + 2 * hs
    wq, bq = attnw[:, idx_q], attnb[:, idx_q]
    wk, bk = attnw[:, idx_k], attnb[:, idx_k]
    wv, bv = attnw[:, idx_v], attnb[:, idx_v]

    # rotate-half as a constant signed permutation matrix (per head block)
    rot = [[0.0] * c for _ in range(c)]
    for h in range(n_head):
        base = h * hs
        for j in range(half):
            rot[base + j + half][base + j] = -1.0       # out[j] = -in[j+half]
        for j in range(half, n_elem):
            rot[base + j - half][base + j] = 1.0        # out[j] = +in[j-half]
    rot = jnp.array(rot, f32)

    # fold the 1/sqrt(hs) attention scale into the q-side projections
    wq, bq = wq * scale, bq * scale
    wqr, bqr = wq @ rot, bq @ rot
    wkr, bkr = wk @ rot, bk @ rot

    # packed projection weights / biases
    w_qkv = jnp.concatenate([wq, wk, wv], axis=1)                       # (C, 3C)
    w_rot = jnp.concatenate([wqr, wkr, jnp.zeros_like(wv)], axis=1)     # (C, 3C)
    b_qkv = jnp.concatenate([bq, bk, bv], axis=1)                       # (1, 3C)
    b_rot = jnp.concatenate([bqr, bkr, jnp.zeros_like(bv)], axis=1)     # (1, 3C)

    # rope masks over the packed 3C columns (V columns: cos=1, sin=0)
    cos_blk = jnp.concatenate([cos, jnp.ones((seq, hs - n_elem), f32)], 1)  # (T, hs)
    sin_blk = jnp.concatenate([sin, jnp.zeros((seq, hs - n_elem), f32)], 1)
    cos_c = jnp.tile(cos_blk, (1, n_head))                                  # (T, C)
    sin_c = jnp.tile(sin_blk, (1, n_head))
    cos_p = jnp.concatenate([cos_c, cos_c, jnp.ones((seq, c), f32)], 1)     # (T, 3C)
    sin_p = jnp.concatenate([sin_c, sin_c, jnp.zeros((seq, c), f32)], 1)
    cosm = jnp.tile(cos_p, (batch, 1))                                      # (BT, 3C)
    sinm = jnp.tile(sin_p, (batch, 1))
    bias_roped = b_qkv * cosm + b_rot * sinm                                # (BT, 3C)
    rope_pack = jnp.concatenate([cosm, sinm, bias_roped], axis=0)           # (3BT, 3C)

    # additive causal + same-batch mask over flattened tokens, tiled per head
    idx = jnp.arange(bt)
    allowed = (idx[:, None] // seq == idx[None, :] // seq) & (idx[None, :] <= idx[:, None])
    mask = jnp.where(allowed, 0.0, -1e30).astype(f32)                       # (BT, BT)
    mask_p = jnp.tile(mask, (1, n_head))                                    # (BT, H*BT)

    # head-block mask: rows h*BT..(h+1)*BT-1 keep only head h's 8 columns.
    # Used to block-mask tiled K/V and to compute per-head softmax denominators.
    rowh = jnp.arange(n_head * bt) // bt
    colh = jnp.arange(c) // hs
    blkm = (rowh[:, None] == colh[None, :]).astype(bf16)                    # (H*BT, C)

    # small params packed into one (8, 4C) slab
    def row_pad(vec):
        vec = vec.reshape(-1).astype(f32)
        return jnp.pad(vec, (0, hidden - vec.shape[0]))
    small = jnp.stack([row_pad(ln1w), row_pad(ln1b), row_pad(ln2w), row_pad(ln2b),
                       row_pad(projb), row_pad(mlpb), row_pad(fcb),
                       jnp.zeros((hidden,), f32)])                          # (8, 4C)

    return [
        small, rope_pack, mask_p, blkm,
        w_qkv.astype(bf16), w_rot.astype(bf16),
        projw.astype(bf16), fcw.astype(bf16), mlpw.astype(bf16),
    ]


# ---------------- wrapper ----------------
def block_forward(x, prepped, *, n_head=N_HEAD,
                  parallel_residual=PARALLEL_RESIDUAL):
    b, t, c = x.shape
    x2d = x.reshape(b * t, c)               # fold batch: one kernel invocation

    inputs = [x2d] + list(prepped)
    kernel = partial(block_kernel, n_head=n_head,
                     parallel_residual=parallel_residual)
    vmem = pl.BlockSpec(memory_space=pltpu.MemorySpace.VMEM)
    out2d = pl.pallas_call(
        kernel,
        out_shape=jax.ShapeDtypeStruct((b * t, c), x.dtype),
        in_specs=[vmem] * len(inputs),
        out_specs=vmem,
    )(*inputs)
    return out2d.reshape(b, t, c)


# ---------------- pure-JAX reference (mirrors the PyTorch module) ----------------
def reference_block(x, params, cos, sin):
    (ln1w, ln1b, ln2w, ln2b, attnw, attnb, projw, projb,
     fcw, fcb, mlpw, mlpb) = [p[0] if p.ndim == 2 and p.shape[0] == 1 else p
                              for p in params]
    bsz, t, c = x.shape
    hs = c // N_HEAD

    def ln(v, w, b_):
        mu = v.mean(-1, keepdims=True)
        var = ((v - mu) ** 2).mean(-1, keepdims=True)
        return (v - mu) / jnp.sqrt(var + LN_EPS) * w + b_

    def apply_rope(a):
        ar = a[..., :N_ELEM]
        a1, a2 = ar[..., :N_ELEM // 2], ar[..., N_ELEM // 2:]
        rot = jnp.concatenate([-a2, a1], -1)
        return jnp.concatenate([ar * cos + rot * sin, a[..., N_ELEM:]], -1)

    def attn(v):
        qkv = v @ attnw + attnb
        qkv = qkv.reshape(bsz, t, N_HEAD, 3 * hs).transpose(0, 2, 1, 3)
        q, k, vv = qkv[..., :hs], qkv[..., hs:2 * hs], qkv[..., 2 * hs:]
        q, k = apply_rope(q), apply_rope(k)
        s = jnp.einsum('bhtd,bhsd->bhts', q, k) / math.sqrt(hs)
        mask = jnp.tril(jnp.ones((t, t), bool))
        s = jnp.where(mask, s, -jnp.inf)
        p = jax.nn.softmax(s, -1)
        y = jnp.einsum('bhts,bhsd->bhtd', p, vv)
        y = y.transpose(0, 2, 1, 3).reshape(bsz, t, c)
        return y @ projw + projb

    def mlp(v):
        h = v @ fcw + fcb
        g = 0.5 * h * (1.0 + jax.lax.erf(h / math.sqrt(2.0)))
        return g @ mlpw + mlpb

    if PARALLEL_RESIDUAL:
        return x + attn(ln(x, ln1w, ln1b)) + mlp(ln(x, ln2w, ln2b))
    x1 = x + attn(ln(x, ln1w, ln1b))
    return x1 + mlp(ln(x1, ln2w, ln2b))


# ---------------- main ----------------
if __name__ == "__main__":
    key = jax.random.PRNGKey(0)
    ks = jax.random.split(key, 16)

    def winit(k, shape, scale=0.05):
        return (scale * jax.random.normal(k, shape)).astype(jnp.float32)

    # biases / 1D params stored as (1, dim) for clean 2D handling
    params = [
        jnp.ones((1, N_EMBD), jnp.float32),            # ln1 weight
        jnp.zeros((1, N_EMBD), jnp.float32),           # ln1 bias
        jnp.ones((1, N_EMBD), jnp.float32),            # ln2 weight
        jnp.zeros((1, N_EMBD), jnp.float32),           # ln2 bias
        winit(ks[0], (N_EMBD, 3 * N_EMBD)),            # attn W (in,out), head-interleaved
        winit(ks[1], (1, 3 * N_EMBD)),                 # attn b
        winit(ks[2], (N_EMBD, N_EMBD)),                # attn proj W
        winit(ks[3], (1, N_EMBD)),                     # attn proj b
        winit(ks[4], (N_EMBD, HIDDEN)),                # mlp fc W
        winit(ks[5], (1, HIDDEN)),                     # mlp fc b
        winit(ks[6], (HIDDEN, N_EMBD)),                # mlp proj W
        winit(ks[7], (1, N_EMBD)),                     # mlp proj b
    ]

    cos_full, sin_full = build_rope_cache(BLOCK_SIZE, N_ELEM)
    cos, sin = cos_full[:T], sin_full[:T]              # (T, n_elem)

    x = jax.random.normal(ks[8], (B, T, N_EMBD), jnp.float32)

    prepped = prepare_block_params(params, cos, sin,
                                   batch=B, seq=T, n_head=N_HEAD, n_elem=N_ELEM)
    out = block_forward(x, prepped)
    out = jax.block_until_ready(out)

    ref = reference_block(x, params, cos, sin)
    assert out.shape == (B, T, N_EMBD)
    # bf16 matmul inputs + approx reciprocal => ~1e-3-level error vs f32 reference
    assert jnp.allclose(out, ref, atol=2e-2, rtol=2e-2), (
        f"max abs err {jnp.max(jnp.abs(out - ref))}")
    print("KERNEL_OK")
</pallas_src>

<mosaic_0001>
module attributes {stable_mosaic.version = 11 : i64} {
  func.func @block_kernel(%arg0: memref<16x32xf32, #tpu.memory_space<vmem>>, %arg1: memref<8x128xf32, #tpu.memory_space<vmem>>, %arg2: memref<48x96xf32, #tpu.memory_space<vmem>>, %arg3: memref<16x64xf32, #tpu.memory_space<vmem>>, %arg4: memref<64x32xbf16, #tpu.memory_space<vmem>>, %arg5: memref<32x96xbf16, #tpu.memory_space<vmem>>, %arg6: memref<32x96xbf16, #tpu.memory_space<vmem>>, %arg7: memref<32x32xbf16, #tpu.memory_space<vmem>>, %arg8: memref<32x128xbf16, #tpu.memory_space<vmem>>, %arg9: memref<128x32xbf16, #tpu.memory_space<vmem>>, %arg10: memref<16x32xf32, #tpu.memory_space<vmem>>) attributes {dimension_semantics = [], scalar_prefetch = 0 : i64, scratch_operands = 0 : i64, tpu.core_type = #tpu.core_type<tc>} {
    %c0 = arith.constant 0 : index
    %c0_0 = arith.constant 0 : index
    %0 = vector.load %arg0[%c0, %c0_0] : memref<16x32xf32, #tpu.memory_space<vmem>>, vector<16x32xf32>
    %c0_1 = arith.constant 0 : index
    %c0_2 = arith.constant 0 : index
    %1 = vector.load %arg1[%c0_1, %c0_2] : memref<8x128xf32, #tpu.memory_space<vmem>>, vector<8x128xf32>
    %2 = vector.extract_strided_slice %1 {offsets = [0, 0], sizes = [1, 32], strides = [1, 1]} : vector<8x128xf32> to vector<1x32xf32>
    %3 = vector.extract_strided_slice %1 {offsets = [1, 0], sizes = [1, 32], strides = [1, 1]} : vector<8x128xf32> to vector<1x32xf32>
    %4 = vector.extract_strided_slice %1 {offsets = [2, 0], sizes = [1, 32], strides = [1, 1]} : vector<8x128xf32> to vector<1x32xf32>
    %5 = vector.extract_strided_slice %1 {offsets = [3, 0], sizes = [1, 32], strides = [1, 1]} : vector<8x128xf32> to vector<1x32xf32>
    %6 = vector.extract_strided_slice %1 {offsets = [4, 0], sizes = [1, 32], strides = [1, 1]} : vector<8x128xf32> to vector<1x32xf32>
    %7 = vector.extract_strided_slice %1 {offsets = [5, 0], sizes = [1, 32], strides = [1, 1]} : vector<8x128xf32> to vector<1x32xf32>
    %8 = vector.extract_strided_slice %1 {offsets = [6, 0], sizes = [1, 128], strides = [1, 1]} : vector<8x128xf32> to vector<1x128xf32>
    %c0_3 = arith.constant 0 : index
    %c0_4 = arith.constant 0 : index
    %9 = vector.load %arg2[%c0_3, %c0_4] : memref<48x96xf32, #tpu.memory_space<vmem>>, vector<48x96xf32>
    %10 = vector.extract_strided_slice %9 {offsets = [0, 0], sizes = [16, 96], strides = [1, 1]} : vector<48x96xf32> to vector<16x96xf32>
    %11 = vector.extract_strided_slice %9 {offsets = [16, 0], sizes = [16, 96], strides = [1, 1]} : vector<48x96xf32> to vector<16x96xf32>
    %12 = vector.extract_strided_slice %9 {offsets = [32, 0], sizes = [16, 96], strides = [1, 1]} : vector<48x96xf32> to vector<16x96xf32>
    %cst = arith.constant dense<0.000000e+00> : vector<16xf32>
    %13 = vector.multi_reduction <add>, %0, %cst [1] : vector<16x32xf32> to vector<16xf32>
    %14 = vector.shape_cast %13 : vector<16xf32> to vector<16x1xf32>
    %cst_5 = arith.constant 3.200000e+01 : f32
    %15 = vector.broadcast %cst_5 : f32 to vector<16x1xf32>
    %16 = arith.divf %14, %15 : vector<16x1xf32>
    %17 = vector.broadcast %16 : vector<16x1xf32> to vector<16x32xf32>
    %18 = arith.subf %0, %17 : vector<16x32xf32>
    %19 = arith.mulf %18, %18 : vector<16x32xf32>
    %cst_6 = arith.constant dense<0.000000e+00> : vector<16xf32>
    %20 = vector.multi_reduction <add>, %19, %cst_6 [1] : vector<16x32xf32> to vector<16xf32>
    %21 = vector.shape_cast %20 : vector<16xf32> to vector<16x1xf32>
    %cst_7 = arith.constant 3.200000e+01 : f32
    %22 = vector.broadcast %cst_7 : f32 to vector<16x1xf32>
    %23 = arith.divf %21, %22 : vector<16x1xf32>
    %cst_8 = arith.constant 9.99999974E-6 : f32
    %24 = vector.broadcast %cst_8 : f32 to vector<16x1xf32>
    %25 = arith.addf %23, %24 : vector<16x1xf32>
    %26 = math.rsqrt %25 : vector<16x1xf32>
    %27 = vector.broadcast %26 : vector<16x1xf32> to vector<16x32xf32>
    %28 = arith.mulf %18, %27 : vector<16x32xf32>
    %29 = vector.broadcast %2 : vector<1x32xf32> to vector<16x32xf32>
    %30 = arith.mulf %28, %29 : vector<16x32xf32>
    %31 = vector.broadcast %3 : vector<1x32xf32> to vector<16x32xf32>
    %32 = arith.addf %30, %31 : vector<16x32xf32>
    %33 = arith.truncf %32 : vector<16x32xf32> to vector<16x32xbf16>
    %c0_9 = arith.constant 0 : index
    %c0_10 = arith.constant 0 : index
    %34 = vector.load %arg5[%c0_9, %c0_10] : memref<32x96xbf16, #tpu.memory_space<vmem>>, vector<32x96xbf16>
    %cst_11 = arith.constant dense<0.000000e+00> : vector<16x96xf32>
    %35 = tpu.matmul %33, %34, %cst_11 {dimension_numbers = #tpu.dot_dimension_numbers<[1], [0], [0], [1], [0, 0, 1, 1], [], []>} : vector<16x32xbf16>, vector<32x96xbf16>, vector<16x96xf32> -> vector<16x96xf32>
    %c0_12 = arith.constant 0 : index
    %c0_13 = arith.constant 0 : index
    %36 = vector.load %arg6[%c0_12, %c0_13] : memref<32x96xbf16, #tpu.memory_space<vmem>>, vector<32x96xbf16>
    %cst_14 = arith.constant dense<0.000000e+00> : vector<16x96xf32>
    %37 = tpu.matmul %33, %36, %cst_14 {dimension_numbers = #tpu.dot_dimension_numbers<[1], [0], [0], [1], [0, 0, 1, 1], [], []>} : vector<16x32xbf16>, vector<32x96xbf16>, vector<16x96xf32> -> vector<16x96xf32>
    %38 = arith.mulf %35, %10 : vector<16x96xf32>
    %39 = arith.mulf %37, %11 : vector<16x96xf32>
    %40 = arith.addf %38, %39 : vector<16x96xf32>
    %41 = arith.addf %40, %12 : vector<16x96xf32>
    %42 = vector.extract_strided_slice %41 {offsets = [0, 0], sizes = [16, 32], strides = [1, 1]} : vector<16x96xf32> to vector<16x32xf32>
    %43 = arith.truncf %42 : vector<16x32xf32> to vector<16x32xbf16>
    %44 = vector.extract_strided_slice %41 {offsets = [0, 32], sizes = [16, 32], strides = [1, 1]} : vector<16x96xf32> to vector<16x32xf32>
    %45 = vector.extract_strided_slice %41 {offsets = [0, 64], sizes = [16, 32], strides = [1, 1]} : vector<16x96xf32> to vector<16x32xf32>
    %c0_15 = arith.constant 0 : index
    %c0_16 = arith.constant 0 : index
    %46 = vector.load %arg4[%c0_15, %c0_16] : memref<64x32xbf16, #tpu.memory_space<vmem>>, vector<64x32xbf16>
    %47 = arith.truncf %44 : vector<16x32xf32> to vector<16x32xbf16>
    %48 = tpu.concatenate %47, %47, %47, %47 in 0 : vector<16x32xbf16>, vector<16x32xbf16>, vector<16x32xbf16>, vector<16x32xbf16> -> vector<64x32xbf16>
    %49 = arith.mulf %48, %46 : vector<64x32xbf16>
    %50 = arith.truncf %45 : vector<16x32xf32> to vector<16x32xbf16>
    %51 = tpu.concatenate %50, %50, %50, %50 in 0 : vector<16x32xbf16>, vector<16x32xbf16>, vector<16x32xbf16>, vector<16x32xbf16> -> vector<64x32xbf16>
    %52 = arith.mulf %51, %46 : vector<64x32xbf16>
    %cst_17 = arith.constant dense<0.000000e+00> : vector<16x64xf32>
    %53 = tpu.matmul %43, %49, %cst_17 {dimension_numbers = #tpu.dot_dimension_numbers<[1], [1], [0], [0], [0, 0, 1, 0], [], []>} : vector<16x32xbf16>, vector<64x32xbf16>, vector<16x64xf32> -> vector<16x64xf32>
    %c0_18 = arith.constant 0 : index
    %c0_19 = arith.constant 0 : index
    %54 = vector.load %arg3[%c0_18, %c0_19] : memref<16x64xf32, #tpu.memory_space<vmem>>, vector<16x64xf32>
    %55 = arith.addf %53, %54 : vector<16x64xf32>
    %cst_20 = arith.constant dense<0xFF800000> : vector<16xf32>
    %56 = vector.multi_reduction <maximumf>, %55, %cst_20 [1] : vector<16x64xf32> to vector<16xf32>
    %57 = vector.shape_cast %56 : vector<16xf32> to vector<16x1xf32>
    %58 = vector.broadcast %57 : vector<16x1xf32> to vector<16x64xf32>
    %59 = arith.subf %55, %58 : vector<16x64xf32>
    %60 = math.exp %59 : vector<16x64xf32>
    %61 = arith.truncf %60 : vector<16x64xf32> to vector<16x64xbf16>
    %cst_21 = arith.constant dense<0.000000e+00> : vector<16x32xf32>
    %62 = tpu.matmul %61, %52, %cst_21 {dimension_numbers = #tpu.dot_dimension_numbers<[1], [0], [0], [1], [0, 0, 1, 1], [], []>} : vector<16x64xbf16>, vector<64x32xbf16>, vector<16x32xf32> -> vector<16x32xf32>
    %cst_22 = arith.constant dense<0.000000e+00> : vector<16x32xf32>
    %63 = tpu.matmul %61, %46, %cst_22 {dimension_numbers = #tpu.dot_dimension_numbers<[1], [0], [0], [1], [0, 0, 1, 1], [], []>} : vector<16x64xbf16>, vector<64x32xbf16>, vector<16x32xf32> -> vector<16x32xf32>
    %64 = tpu.reciprocal %63 {approx = true} : vector<16x32xf32> -> vector<16x32xf32>
    %65 = arith.mulf %62, %64 : vector<16x32xf32>
    %66 = arith.truncf %65 : vector<16x32xf32> to vector<16x32xbf16>
    %c0_23 = arith.constant 0 : index
    %c0_24 = arith.constant 0 : index
    %67 = vector.load %arg7[%c0_23, %c0_24] : memref<32x32xbf16, #tpu.memory_space<vmem>>, vector<32x32xbf16>
    %cst_25 = arith.constant dense<0.000000e+00> : vector<16x32xf32>
    %68 = tpu.matmul %66, %67, %cst_25 {dimension_numbers = #tpu.dot_dimension_numbers<[1], [0], [0], [1], [0, 0, 1, 1], [], []>} : vector<16x32xbf16>, vector<32x32xbf16>, vector<16x32xf32> -> vector<16x32xf32>
    %69 = vector.broadcast %6 : vector<1x32xf32> to vector<16x32xf32>
    %70 = arith.addf %68, %69 : vector<16x32xf32>
    %71 = vector.broadcast %4 : vector<1x32xf32> to vector<16x32xf32>
    %72 = arith.mulf %28, %71 : vector<16x32xf32>
    %73 = vector.broadcast %5 : vector<1x32xf32> to vector<16x32xf32>
    %74 = arith.addf %72, %73 : vector<16x32xf32>
    %75 = arith.addf %0, %70 : vector<16x32xf32>
    %76 = arith.truncf %74 : vector<16x32xf32> to vector<16x32xbf16>
    %c0_26 = arith.constant 0 : index
    %c0_27 = arith.constant 0 : index
    %77 = vector.load %arg8[%c0_26, %c0_27] : memref<32x128xbf16, #tpu.memory_space<vmem>>, vector<32x128xbf16>
    %cst_28 = arith.constant dense<0.000000e+00> : vector<16x128xf32>
    %78 = tpu.matmul %76, %77, %cst_28 {dimension_numbers = #tpu.dot_dimension_numbers<[1], [0], [0], [1], [0, 0, 1, 1], [], []>} : vector<16x32xbf16>, vector<32x128xbf16>, vector<16x128xf32> -> vector<16x128xf32>
    %79 = vector.broadcast %8 : vector<1x128xf32> to vector<16x128xf32>
    %80 = arith.addf %78, %79 : vector<16x128xf32>
    %cst_29 = arith.constant 5.000000e-01 : f32
    %81 = vector.broadcast %cst_29 : f32 to vector<16x128xf32>
    %82 = arith.mulf %81, %80 : vector<16x128xf32>
    %cst_30 = arith.constant 0.707106769 : f32
    %83 = vector.broadcast %cst_30 : f32 to vector<16x128xf32>
    %84 = arith.mulf %80, %83 : vector<16x128xf32>
    %85 = math.erf %84 : vector<16x128xf32>
    %cst_31 = arith.constant 1.000000e+00 : f32
    %86 = vector.broadcast %cst_31 : f32 to vector<16x128xf32>
    %87 = arith.addf %86, %85 : vector<16x128xf32>
    %88 = arith.mulf %82, %87 : vector<16x128xf32>
    %89 = arith.truncf %88 : vector<16x128xf32> to vector<16x128xbf16>
    %c0_32 = arith.constant 0 : index
    %c0_33 = arith.constant 0 : index
    %90 = vector.load %arg9[%c0_32, %c0_33] : memref<128x32xbf16, #tpu.memory_space<vmem>>, vector<128x32xbf16>
    %cst_34 = arith.constant dense<0.000000e+00> : vector<16x32xf32>
    %91 = tpu.matmul %89, %90, %cst_34 {dimension_numbers = #tpu.dot_dimension_numbers<[1], [0], [0], [1], [0, 0, 1, 1], [], []>} : vector<16x128xbf16>, vector<128x32xbf16>, vector<16x32xf32> -> vector<16x32xf32>
    %92 = vector.broadcast %7 : vector<1x32xf32> to vector<16x32xf32>
    %93 = arith.addf %91, %92 : vector<16x32xf32>
    %94 = arith.addf %75, %93 : vector<16x32xf32>
    %c0_35 = arith.constant 0 : index
    %c0_36 = arith.constant 0 : index
    %95 = vector.load %arg10[%c0_35, %c0_36] : memref<16x32xf32, #tpu.memory_space<vmem>>, vector<16x32xf32>
    tpu.vector_store %arg10[%c0_35, %c0_36], %94 {strides = array<i32>} : memref<16x32xf32, #tpu.memory_space<vmem>>, vector<16x32xf32>,
    return
  }
}

</mosaic_0001>

<bundles_post_ra>
// kernel: tpu_custom_call.1
= control target key start
LH: loop header
LB: loop body
LE: loop exit
PB: predicated region body
PF: predicated region fallthrough
CT: control target
= control target key end

     0   :  { %15 = vsyncpa [#allocation3], 0  ;;  %s1390_s0 = inlined_call_operand.vmem [shape: f32[16,32], index: 0, kind: input, shape index: {}]   ;;  %s1391_s1 = inlined_call_operand.hbm [shape: f32[8,128], index: 1, kind: input, shape index: {}]   ;;  %s1392_s2 = inlined_call_operand.vmem [shape: f32[48,96], index: 2, kind: input, shape index: {}]   ;;  %s1393_s3 = inlined_call_operand.vmem [shape: f32[16,64], index: 3, kind: input, shape index: {}]   ;;  %s1394_s4 = inlined_call_operand.vmem [shape: bf16[64,32], index: 4, kind: input, shape index: {}]   ;;  %s1395_s5 = inlined_call_operand.vmem [shape: bf16[32,96], index: 5, kind: input, shape index: {}]   ;;  %s1396_s6 = inlined_call_operand.vmem [shape: bf16[32,96], index: 6, kind: input, shape index: {}]   ;;  %s1397_s7 = inlined_call_operand.vmem [shape: bf16[32,32], index: 7, kind: input, shape index: {}]   ;;  %s1398_s8 = inlined_call_operand.hbm [shape: bf16[32,128], index: 8, kind: input, shape index: {}]   ;;  %s1399_s9 = inlined_call_operand.vmem [shape: bf16[128,32], index: 9, kind: input, shape index: {}]   ;;  %s1400_s10 = inlined_call_operand.hbm [shape: f32[16,32], index: 10, kind: output, shape index: {}]  }
   0x1   :  { %16 = vsyncpa [#allocation6], 0 }
   0x2   :  { %17 = vsyncpa [#allocation4], 0  ;;  %s1056_s13 = smov [#allocation2]   ;;  %s1057_s15 = smov [#allocation5]  }
   0x3   :  { %s26_s14 = sshll.u32 %s1056_s13, 4  ;;  %s47_s16 = sshll.u32 %s1057_s15, 4  ;;  %s27_s14 = int_to_ptr.vmem [resolvable:$true] %s26_s14  ;;  %s1122_s16 = int_to_ptr.vmem [resolvable:$true] %s47_s16 }
   0x4   :  { %s984_s19 = scalar_lea.hbm %s1391_s1, 128 }
   0x5   :  { %p985_p0 = scmp.ne.s32.totalorder %s1391_s1, %s984_s19  ;;  %p988_p1 = scmp.lt.u32.totalorder %s984_s19, %s1391_s1 }
   0x7   :  { %p990_p2 = pnand %p988_p1, %p985_p0 }
   0x9   :  { %993 = shalt.err (!%p990_p2)
}
   0xa   :  { %s994_s24 = scalar_lea.vmem %s27_s14, 128  ;;  %p999_p4 = scmp.lt.s32.totalorder %s27_s14, %s27_s14 }
   0xb   :  { %p995_p3 = scmp.ne.s32.totalorder %s27_s14, %s994_s24  ;;  %p1000_p5 = scmp.lt.s32.totalorder %s994_s24, %s994_s24 }
   0xd   :  { %p1001_p6 = por %p1000_p5, %p999_p4 }
   0xf   :  { %p1002_p7 = pnand %p1001_p6, %p995_p3 }
  0x11   :  { %1005 = shalt.err (!%p1002_p7)
}
  0x12   :  { %29 = dma.hbm_to_vmem [thread:$0]  %s1391_s1, 128, %s27_s14, [#allocation3]  }
  0x13   :  { %s1006_s29 = scalar_lea.hbm %s1398_s8, 256 }
  0x14   :  { %p1007_p8 = scmp.ne.s32.totalorder %s1398_s8, %s1006_s29  ;;  %p1010_p9 = scmp.lt.u32.totalorder %s1006_s29, %s1398_s8 }
  0x16   :  { %p1012_p10 = pnand %p1010_p9, %p1007_p8 }
  0x18   :  { %1015 = shalt.err (!%p1012_p10)
}
  0x19   :  { %s1016_s15 = scalar_lea.vmem %s1122_s16, 256  ;;  %p1021_p12 = scmp.lt.s32.totalorder %s1122_s16, %s1122_s16 }
  0x1a   :  { %p1017_p11 = scmp.ne.s32.totalorder %s1122_s16, %s1016_s15  ;;  %p1022_p13 = scmp.lt.s32.totalorder %s1016_s15, %s1016_s15 }
  0x1c   :  { %p1023_p0 = por %p1022_p13, %p1021_p12 }
  0x1e   :  { %p1024_p1 = pnand %p1023_p0, %p1017_p11 }
  0x20   :  { %1027 = shalt.err (!%p1024_p1)
}
  0x21   :  { %s1058_s1 = smov 64   ;;  %s1059_s14 = smov 4  }
  0x22   :  { %53 = dma.hbm_to_vmem [thread:$0]  %s1398_s8, 256, %s1122_s16, [#allocation6], %s1058_s1, %s1058_s1, %s1059_s14  }
  0x23   :  { %1050 = dma.done.wait [#allocation3], 128  }
  0x24   :  { %1051 = vsyncadd [#allocation3], 4294967168 }
  0x25   :  { %1052 = dma.done.wait [#allocation6], 256  }
  0x26   :  { %1053 = vsyncadd [#allocation6], 4294967040  ;;  %vm72_vm0 = vcmask 261120   ;;  %v1158_v0 = vld [vmem:[%s1390_s0] sm:$0xff]  ;;  %v1163_v1 = vld [vmem:[%s1390_s0 + $0x8] sm:$0xff]  ;;  %v1060_v15 = vmov 0.0   ;;  %v100_v24 = vlaneseq }
  0x27   :  { %v73_v2 = vsel %vm72_vm0, %v1158_v0, 0.0  ;;  %v76_v3 = vsel %vm72_vm0, %v1163_v1, 0.0  ;;  %v948_v14 = vld [vmem:[%s1395_s5] sm:$0xff]   ;;  %841 = vmatprep.subr.bf16.mxu1 %v1060_v15  ;;  %857 = vmatprep.subr.bf16.mxu0 %v1060_v15  ;;  %v949_v16 = vld [vmem:[%s1395_s5 + $0x8] sm:$0xff]   ;;  %vm1061_vm1 = vmmov 0   ;;  %s1062_s5 = smov 32  }
  0x28   :  { %74 = vadd.xlane.f32.xlu0 %v73_v2  ;;  %842 = vmatpush3.bf16.msra.mxu1 %v948_v14  ;;  %v1190_v17 = vld [vmem:[%s1394_s4 + $0x8] sm:$0xff]   ;;  %v1195_v18 = vld [vmem:[%s1394_s4] sm:$0xff]   ;;  %v1201_v19 = vld [vmem:[%s1394_s4 + $0x10] sm:$0xff]   ;;  %v1211_v28 = vshrl.u32 %v100_v24, 7  ;;  %s1063_s24 = smov 96   ;;  %vm369_vm2 = vcmask 523264  }
  0x29   :  { %843 = vmatprep.subr.bf16.mxu1 %v1060_v15  ;;  %845 = vmatprep.mubr.msk.bf16.mxu1 %vm1061_vm1, %v1060_v15  ;;  %v1208_v20 = vld [vmem:[%s1394_s4 + $0x18] sm:$0xff]   ;;  %v1215_v31 = vld [vmem:[#allocation2] sm:$0xff]  ;;  %v951_v53 = vld [vmem:[%s1396_s6 + $0x8] sm:$0xff]  }
  0x2a   :  { %865 = vmatprep.mubr.msk.bf16.mxu0 %vm1061_vm1, %v1060_v15  ;;  %v559_v29 = vsub.s32 2, %v1211_v28  ;;  %v102_v30 = vsub.s32 0, %v1211_v28  ;;  %v108_v33 = vsub.s32 1, %v1211_v28  ;;  %v565_v37 = vsub.s32 3, %v1211_v28  ;;  %v950_v50 = vld [vmem:[%s1396_s6] sm:$0xff]   ;;  %v68_v59 = vld [vmem:[%s1392_s2 + $0x10] sm:$0xff] }
  0x2b   :  { %v66_v58 = vld [vmem:[%s1392_s2] sm:$0xff]  ;;  %v67_v60 = vld [vmem:[%s1392_s2 + $0x8] sm:$0xff]  ;;  %v69_v62 = vld [vmem:[%s1392_s2 + $0x18] sm:$0xff] }
  0x2c   :  { %77 = vadd.xlane.f32.xlu0 %v76_v3  ;;  %844 = vmatpush3.bf16.msra.mxu1 %v949_v16  ;;  %v560_v34 = vrot.slane %v1215_v31, %v559_v29  ;;  %v103_v36 = vrot.slane %v1215_v31, %v102_v30  ;;  %v109_v39 = vrot.slane %v1215_v31, %v108_v33 }
  0x2d   :  { %849 = vmatprep.subr.bf16.mxu1 %v1060_v15  ;;  %v566_v43 = vrot.slane %v1215_v31, %v565_v37 }
  0x42   :  { %267 = vrot.lane.b32.xlu0 %v1195_v18, %s1062_s5 }
  0xb5   :  { %v75_v4 = vpop.xlane.xlu0 %74 }
  0xb6   :  { %v80_v5 = vmul.f32 0.03125, %v75_v4 }
  0xb8   :  { %v82_v6 = vsub.f32 %v1158_v0, %v80_v5 }
  0xb9   :  { %v78_v7 = vpop.xlane.xlu0 %77 }
  0xba   :  { %v81_v8 = vmul.f32 0.03125, %v78_v7  ;;  %v84_v9 = vmul.f32 %v82_v6, %v82_v6 }
  0xbc   :  { %v83_v10 = vsub.f32 %v1163_v1, %v81_v8  ;;  %v86_v11 = vsel %vm72_vm0, %v84_v9, 0.0 }
  0xbd   :  { %87 = vadd.xlane.f32.xlu1 %v86_v11  ;;  %v71_v11 = vld [vmem:[%s1392_s2 + $0x28] sm:$0xff] }
  0xbe   :  { %v85_v12 = vmul.f32 %v83_v10, %v83_v10 }
  0xc0   :  { %v89_v13 = vsel %vm72_vm0, %v85_v12, 0.0 }
  0xc1   :  { %90 = vadd.xlane.f32.xlu1 %v89_v13 }
  0xd2   :  { %269 = vrot.lane.b32.xlu1 %v1190_v17, %s1062_s5 }
  0xd6   :  { %271 = vrot.lane.b32.xlu1 %v1201_v19, %s1062_s5 }
  0xda   :  { %273 = vrot.lane.b32.xlu1 %v1208_v20, %s1062_s5 }
 0x14a   :  { %v88_v21 = vpop.xlane.xlu1 %87 }
 0x14b   :  { %v92_v22 = vmul.f32 0.03125, %v88_v21  ;;  %v268_v21 = vpop.permute.xlu0 %267 }
 0x14d   :  { %v94_v23 = vadd.f32 1e-05, %v92_v22 }
 0x14e   :  { %v91_v25 = vpop.xlane.xlu1 %90 }
 0x14f   :  { %968 = vrsqrt.f32 %v94_v23  ;;  %v93_v26 = vmul.f32 0.03125, %v91_v25 }
 0x151   :  { %v95_v27 = vadd.f32 1e-05, %v93_v26 }
 0x152   :  { %v270_v63 = vpop.permute.xlu1 %269 }
 0x153   :  { %970 = vrsqrt.f32 %v95_v27 }
 0x156   :  { %v272_v13 = vpop.permute.xlu1 %271 }
 0x159   :  { %v969_v32 = vpop.eup %968 }
 0x15a   :  { %v98_v35 = vmul.f32 %v969_v32, %v82_v6  ;;  %v274_v25 = vpop.permute.xlu1 %273 }
 0x15c   :  { %v561_v40 = vmul.f32 %v560_v34, %v98_v35  ;;  %v104_v42 = vmul.f32 %v103_v36, %v98_v35 }
 0x15d   :  { %v971_v38 = vpop.eup %970 }
 0x15e   :  { %v99_v41 = vmul.f32 %v971_v38, %v83_v10  ;;  %v110_v46 = vadd.f32 %v109_v39, %v104_v42  ;;  %v1223_v48 = vadd.f32 %v566_v43, %v561_v40  ;;  %v70_v10 = vld [vmem:[%s1392_s2 + $0x20] sm:$0xff] }
 0x160   :  { %v562_v44 = vmul.f32 %v560_v34, %v99_v41  ;;  %v105_v45 = vmul.f32 %v103_v36, %v99_v41 }
 0x162   :  { %v111_v47 = vadd.f32 %v109_v39, %v105_v45  ;;  %v1225_v49 = vadd.f32 %v566_v43, %v562_v44 }
 0x164   :  { %v112_v51 = vpack.c.bf16 %v111_v47, %v110_v46  ;;  %v571_v52 = vpack.c.bf16 %v1225_v49, %v1223_v48  ;;  %v299_v46 = vld [vmem:[%s1393_s3] sm:$0xff]  ;;  %v962_v48 = vld [vmem:[%s1399_s9 + $0x10] sm:$0xff]   ;;  %v963_v49 = vld [vmem:[%s1399_s9 + $0x18] sm:$0xff]  }
 0x166   :  { %846 = vmatmul.mubr.msk.bf16.vlgmr.msra.gmra.mrb[0].mxu1 %vm72_vm0, %v112_v51 }
 0x167   :  { %850 = vmatpush3.bf16.msra.mxu1 %v950_v50  ;;  %853 = vmatprep.mubr.msk.bf16.mxu1 %vm1061_vm1, %v1060_v15  ;;  %v300_v50 = vld [vmem:[%s1393_s3 + $0x8] sm:$0xff] }
 0x168   :  { %851 = vmatprep.subr.bf16.mxu1 %v1060_v15 }
 0x16b   :  { %852 = vmatpush3.bf16.msra.mxu1 %v951_v53 }
 0x16c   :  { %869 = vmatprep.subr.bf16.mxu1 %v1060_v15 }
 0x16e   :  { %854 = vmatmul.mubr.msk.bf16.vlgmr.msra.gmra.mrb[4].mxu1 %vm72_vm0, %v112_v51 }
 0x16f   :  { %877 = vmatprep.mubr.msk.bf16.mxu1 %vm1061_vm1, %v1060_v15 }
 0x239   :  { %v166_v54 = vpop.f32.mrb[0].mxu1 }
 0x23a   :  { %v847_v55 = vpop.f32.mrb[1].mxu1  ;;  %v230_v2 = vmul.f32 %v166_v54, %v66_v58 }
 0x23b   :  { %v169_v56 = vpop.f32.mrb[2].mxu1 }
 0x23c   :  { %v848_v57 = vpop.f32.mrb[3].mxu1  ;;  %v231_v6 = vmul.f32 %v169_v56, %v67_v60 }
 0x241   :  { %v223_v61 = vpop.f32.mrb[4].mxu1 }
 0x242   :  { %v232_v3 = vmul.f32 %v223_v61, %v68_v59  ;;  %v855_v4 = vpop.f32.mrb[5].mxu1 }
 0x243   :  { %v226_v5 = vpop.f32.mrb[6].mxu1 }
 0x244   :  { %v234_v7 = vadd.f32 %v232_v3, %v230_v2  ;;  %v233_v8 = vmul.f32 %v226_v5, %v69_v62  ;;  %v856_v9 = vpop.f32.mrb[7].mxu1 }
 0x246   :  { %v235_v12 = vadd.f32 %v233_v8, %v231_v6  ;;  %v236_v14 = vadd.f32 %v234_v7, %v70_v10 }
 0x248   :  { %v237_v16 = vadd.f32 %v235_v12, %v71_v11 }
 0x24a   :  { %v1261_v22 = vpack.c.bf16 %v237_v16, %v236_v14 }
 0x24c   :  { %v280_v23 = vmul.bf16 %v270_v63, %v1261_v22  ;;  %v279_v24 = vmul.bf16 %v268_v21, %v1261_v22  ;;  %v281_v26 = vmul.bf16 %v272_v13, %v1261_v22  ;;  %v282_v27 = vmul.bf16 %v274_v25, %v1261_v22  ;;  %v958_v25 = vld [vmem:[#allocation5] sm:$0xff]  }
 0x24e   :  { %307 = vrot.lane.b32.xlu1 %v280_v23, %s1063_s24  ;;  %305 = vrot.lane.b32.xlu0 %v279_v24, %s1063_s24 }
 0x252   :  { %311 = vrot.lane.b32.xlu1 %v282_v27, %s1063_s24  ;;  %309 = vrot.lane.b32.xlu0 %v281_v26, %s1063_s24  ;;  %v959_v27 = vld [vmem:[#allocation5 + $0x8] sm:$0xff]  }
 0x256   :  { %285 = vrot.lane.b32.xlu1 %v1190_v17, %s1058_s1  ;;  %283 = vrot.lane.b32.xlu0 %v1195_v18, %s1058_s1 }
 0x25a   :  { %289 = vrot.lane.b32.xlu1 %v1208_v20, %s1058_s1  ;;  %287 = vrot.lane.b32.xlu0 %v1201_v19, %s1058_s1 }
 0x2c0   :  { %v308_v29 = vpop.permute.xlu1 %307  ;;  %v306_v30 = vpop.permute.xlu0 %305 }
 0x2c1   :  { %v317_v32 = vsel %vm72_vm0, %v306_v30, 0  ;;  %v320_v37 = vsel %vm72_vm0, %v308_v29, 0  ;;  %v960_v29 = vld [vmem:[%s1399_s9] sm:$0xff]   ;;  %v961_v30 = vld [vmem:[%s1399_s9 + $0x8] sm:$0xff]  }
 0x2c2   :  { %858 = vmatpush3.bf16.xpose.msra.mxu0 %v317_v32  ;;  %v965_v32 = vld [vmem:[%s1399_s9 + $0x28] sm:$0xff]  }
 0x2c3   :  { %859 = vmatprep.subr.bf16.mxu0 %v1060_v15 }
 0x2c4   :  { %v312_v33 = vpop.permute.xlu1 %311  ;;  %v310_v34 = vpop.permute.xlu0 %309 }
 0x2c5   :  { %v323_v40 = vsel %vm72_vm0, %v310_v34, 0  ;;  %v326_v41 = vsel %vm72_vm0, %v312_v33, 0  ;;  %v966_v33 = vld [vmem:[%s1399_s9 + $0x30] sm:$0xff]   ;;  %v967_v34 = vld [vmem:[%s1399_s9 + $0x38] sm:$0xff]  }
 0x2c8   :  { %v286_v35 = vpop.permute.xlu1 %285  ;;  %v284_v36 = vpop.permute.xlu0 %283 }
 0x2c9   :  { %v296_v38 = vmul.bf16 %v286_v35, %v1261_v22  ;;  %v295_v39 = vmul.bf16 %v284_v36, %v1261_v22 }
 0x2ca   :  { %860 = vmatpush3.bf16.xpose.msra.mxu0 %v320_v37  ;;  %v578_v37 = vsub.s32 6, %v1211_v28 }
 0x2cb   :  { %389 = vrot.lane.b32.xlu1 %v296_v38, %s1058_s1  ;;  %387 = vrot.lane.b32.xlu0 %v295_v39, %s1058_s1 }
 0x2cc   :  { %861 = vmatprep.subr.bf16.mxu0 %v1060_v15  ;;  %v288_v42 = vpop.permute.xlu0 %287  ;;  %v290_v43 = vpop.permute.xlu1 %289 }
 0x2cd   :  { %v298_v59 = vmul.bf16 %v290_v43, %v1261_v22  ;;  %v297_v60 = vmul.bf16 %v288_v42, %v1261_v22 }
 0x2d2   :  { %862 = vmatpush3.bf16.xpose.msra.mxu0 %v323_v40  ;;  %v579_v40 = vrot.slane %v1215_v31, %v578_v37 }
 0x2d3   :  { %863 = vmatprep.subr.bf16.mxu0 %v1060_v15 }
 0x2da   :  { %864 = vmatpush3.bf16.xpose.msra.mxu0 %v326_v41 }
 0x2db   :  { %909 = vmatprep.subr.bf16.mxu0 %v1060_v15 }
 0x2e1   :  { %866 = vmatmul.mubr.msk.bf16.vlgmr.msra.gmra.mrb[0].mxu0 %vm72_vm0, %v1261_v22 }
 0x2e2   :  { %925 = vmatprep.mubr.msk.bf16.mxu0 %vm1061_vm1, %v1060_v15  ;;  %910 = vmatpush3.bf16.msra.mxu0 %v960_v29 }
 0x2e3   :  { %911 = vmatprep.subr.bf16.mxu0 %v1060_v15 }
 0x2e6   :  { %912 = vmatpush3.bf16.msra.mxu0 %v961_v30 }
 0x2e7   :  { %913 = vmatprep.subr.bf16.mxu0 %v1060_v15 }
 0x2ea   :  { %914 = vmatpush3.bf16.msra.mxu0 %v962_v48 }
 0x2eb   :  { %915 = vmatprep.subr.bf16.mxu0 %v1060_v15 }
 0x2ee   :  { %916 = vmatpush3.bf16.msra.mxu0 %v963_v49 }
 0x2ef   :  { %917 = vmatprep.subr.bf16.mxu0 %v1060_v15 }
 0x33d   :  { %v388_v44 = vpop.permute.xlu0 %387  ;;  %v390_v45 = vpop.permute.xlu1 %389 }
 0x33e   :  { %870 = vmatpush3.bf16.msra.mxu1 %v388_v44 }
 0x33f   :  { %871 = vmatprep.subr.bf16.mxu1 %v1060_v15 }
 0x342   :  { %872 = vmatpush3.bf16.msra.mxu1 %v390_v45 }
 0x343   :  { %873 = vmatprep.subr.bf16.mxu1 %v1060_v15 }
 0x3b4   :  { %v362_v47 = vpop.f32.mrb[0].mxu0 }
 0x3b5   :  { %v363_v51 = vadd.f32 %v362_v47, %v299_v46  ;;  %v867_v53 = vpop.f32.mrb[1].mxu0 }
 0x3b6   :  { %v365_v54 = vpop.f32.mrb[2].mxu0 }
 0x3b7   :  { %v366_v55 = vadd.f32 %v365_v54, %v300_v50  ;;  %v868_v56 = vpop.f32.mrb[3].mxu0  ;;  %v370_v57 = vsel %vm369_vm2, %v363_v51, -inf }
 0x3b8   :  { %371 = vmax.xlane.f32.xlu0 %v370_v57 }
 0x3b9   :  { %v373_v58 = vsel %vm369_vm2, %v366_v55, -inf }
 0x3ba   :  { %374 = vmax.xlane.f32.xlu1 %v373_v58 }
 0x3cb   :  { %393 = vrot.lane.b32.xlu1 %v298_v59, %s1058_s1 }
 0x3ce   :  { %391 = vrot.lane.b32.xlu0 %v297_v60, %s1058_s1  ;;  %v499_v60 = vsub.s32 4, %v1211_v28 }
 0x445   :  { %v372_v61 = vpop.xlane.xlu0 %371 }
 0x446   :  { %v376_v62 = vsub.f32 %v363_v51, %v372_v61  ;;  %v500_v61 = vrot.slane %v1215_v31, %v499_v60 }
 0x447   :  { %v375_v63 = vpop.xlane.xlu1 %374 }
 0x448   :  { %v378_v2 = vmul.f32 1.442695, %v376_v62  ;;  %v377_v3 = vsub.f32 %v366_v55, %v375_v63  ;;  %v929_v62 = vadd.f32 %v500_v61, %v1158_v0  ;;  %v665_v63 = vsub.s32 5, %v1211_v28 }
 0x449   :  { %v392_v4 = vpop.permute.xlu0 %391 }
 0x44a   :  { %v380_v5 = vmul.f32 1.442695, %v377_v3  ;;  %874 = vmatpush3.bf16.msra.mxu1 %v392_v4  ;;  %972 = vpow2.f32 %v378_v2  ;;  %v933_v2 = vadd.f32 %v500_v61, %v1163_v1  ;;  %v666_v4 = vrot.slane %v1215_v31, %v665_v63 }
 0x44b   :  { %875 = vmatprep.subr.bf16.mxu1 %v1060_v15  ;;  %v394_v6 = vpop.permute.xlu1 %393 }
 0x44c   :  { %974 = vpow2.f32 %v380_v5 }
 0x44e   :  { %876 = vmatpush3.bf16.msra.mxu1 %v394_v6 }
 0x44f   :  { %881 = vmatprep.subr.bf16.mxu1 %v1060_v15 }
 0x454   :  { %v973_v7 = vpop.eup %972 }
 0x456   :  { %v975_v8 = vpop.eup %974 }
 0x457   :  { %v382_v9 = vpack.c.bf16 %v975_v8, %v973_v7 }
 0x459   :  { %878 = vmatmul.mubr.msk.bf16.vlgmr.msra.gmra.mrb[8].mxu1 %vm369_vm2, %v382_v9 }
 0x45a   :  { %882 = vmatpush3.bf16.msra.mxu1 %v1195_v18  ;;  %889 = vmatprep.mubr.msk.bf16.mxu1 %vm1061_vm1, %v1060_v15  ;;  %v956_v18 = vld [vmem:[%s1397_s7] sm:$0xff]  }
 0x45b   :  { %883 = vmatprep.subr.bf16.mxu1 %v1060_v15 }
 0x45e   :  { %884 = vmatpush3.bf16.msra.mxu1 %v1190_v17  ;;  %v957_v17 = vld [vmem:[%s1397_s7 + $0x8] sm:$0xff]  }
 0x45f   :  { %885 = vmatprep.subr.bf16.mxu1 %v1060_v15 }
 0x462   :  { %886 = vmatpush3.bf16.msra.mxu1 %v1201_v19 }
 0x463   :  { %887 = vmatprep.subr.bf16.mxu1 %v1060_v15 }
 0x466   :  { %888 = vmatpush3.bf16.msra.mxu1 %v1208_v20 }
 0x467   :  { %893 = vmatprep.subr.bf16.mxu1 %v1060_v15 }
 0x469   :  { %890 = vmatmul.mubr.msk.bf16.vlgmr.msra.gmra.mrb[12].mxu1 %vm369_vm2, %v382_v9 }
 0x46a   :  { %897 = vmatprep.mubr.msk.bf16.mxu1 %vm1061_vm1, %v1060_v15  ;;  %894 = vmatpush3.bf16.msra.mxu1 %v956_v18 }
 0x46b   :  { %895 = vmatprep.subr.bf16.mxu1 %v1060_v15 }
 0x46e   :  { %896 = vmatpush3.bf16.msra.mxu1 %v957_v17 }
 0x46f   :  { %901 = vmatprep.subr.bf16.mxu1 %v1060_v15 }
 0x52c   :  { %v436_v19 = vpop.f32.mrb[8].mxu1 }
 0x52d   :  { %v879_v20 = vpop.f32.mrb[9].mxu1 }
 0x52e   :  { %v439_v10 = vpop.f32.mrb[10].mxu1 }
 0x52f   :  { %v880_v11 = vpop.f32.mrb[11].mxu1 }
 0x53c   :  { %v481_v12 = vpop.f32.mrb[12].mxu1 }
 0x53d   :  { %976 = vrcp.f32 %v481_v12  ;;  %v891_v13 = vpop.f32.mrb[13].mxu1 }
 0x53e   :  { %v484_v14 = vpop.f32.mrb[14].mxu1 }
 0x53f   :  { %978 = vrcp.f32 %v484_v14  ;;  %v892_v16 = vpop.f32.mrb[15].mxu1 }
 0x547   :  { %v977_v21 = vpop.eup %976 }
 0x548   :  { %v490_v22 = vmul.f32 %v977_v21, %v436_v19 }
 0x549   :  { %v979_v23 = vpop.eup %978 }
 0x54a   :  { %v491_v24 = vmul.f32 %v979_v23, %v439_v10 }
 0x54c   :  { %v492_v26 = vpack.c.bf16 %v491_v24, %v490_v22 }
 0x54e   :  { %898 = vmatmul.mubr.msk.bf16.vlgmr.msra.gmra.mrb[16].mxu1 %vm72_vm0, %v492_v26 }
 0x54f   :  { %902 = vmatpush3.bf16.msra.mxu1 %v958_v25  ;;  %905 = vmatprep.mubr.msk.bf16.mxu1 %vm1061_vm1, %v1060_v15 }
 0x550   :  { %903 = vmatprep.subr.bf16.mxu1 %v1060_v15 }
 0x553   :  { %904 = vmatpush3.bf16.msra.mxu1 %v959_v27 }
 0x556   :  { %906 = vmatmul.mubr.msk.bf16.vlgmr.msra.gmra.mrb[20].mxu1 %vm72_vm0, %v571_v52  ;;  %v964_v52 = vld [vmem:[%s1399_s9 + $0x20] sm:$0xff]   ;;  %s1064_s9 = smov [#allocation7]  }
 0x557   :  { %918 = vmatpush3.bf16.msra.mxu0 %v964_v52  ;;  %s765_s0 = sshll.u32 %s1064_s9, 4  ;;  %s766_s0 = int_to_ptr.vmem [resolvable:$true] %s765_s0 }
 0x558   :  { %919 = vmatprep.subr.bf16.mxu0 %v1060_v15  ;;  %s1028_s8 = scalar_lea.vmem %s766_s0, 256  ;;  %p1033_p3 = scmp.lt.s32.totalorder %s766_s0, %s766_s0 }
 0x559   :  { %p1029_p2 = scmp.ne.s32.totalorder %s766_s0, %s1028_s8  ;;  %p1034_p4 = scmp.lt.s32.totalorder %s1028_s8, %s1028_s8 }
 0x55b   :  { %920 = vmatpush3.bf16.msra.mxu0 %v965_v32  ;;  %p1035_p5 = por %p1034_p4, %p1033_p3 }
 0x55c   :  { %921 = vmatprep.subr.bf16.mxu0 %v1060_v15 }
 0x55d   :  { %p1036_p6 = pnand %p1035_p5, %p1029_p2 }
 0x55f   :  { %922 = vmatpush3.bf16.msra.mxu0 %v966_v33 }
 0x560   :  { %923 = vmatprep.subr.bf16.mxu0 %v1060_v15 }
 0x563   :  { %924 = vmatpush3.bf16.msra.mxu0 %v967_v34 }
 0x621   :  { %v550_v35 = vpop.f32.mrb[16].mxu1 }
 0x622   :  { %v899_v36 = vpop.f32.mrb[17].mxu1  ;;  %v930_v3 = vadd.f32 %v929_v62, %v550_v35 }
 0x623   :  { %v553_v38 = vpop.f32.mrb[18].mxu1 }
 0x624   :  { %v900_v39 = vpop.f32.mrb[19].mxu1  ;;  %v934_v5 = vadd.f32 %v933_v2, %v553_v38  ;;  %v931_v6 = vadd.f32 %v930_v3, %v666_v4 }
 0x626   :  { %v935_v18 = vadd.f32 %v934_v5, %v666_v4 }
 0x629   :  { %v629_v41 = vpop.f32.mrb[20].mxu1 }
 0x62a   :  { %v630_v42 = vadd.f32 %v629_v41, %v579_v40  ;;  %v907_v43 = vpop.f32.mrb[21].mxu1 }
 0x62b   :  { %v632_v44 = vpop.f32.mrb[22].mxu1 }
 0x62c   :  { %v638_v45 = vmul.f32 0.70710677, %v630_v42  ;;  %v633_v46 = vadd.f32 %v632_v44, %v579_v40  ;;  %v908_v15 = vpop.f32.mrb[23].mxu1  ;;  %v636_v54 = vmul.f32 0.5, %v630_v42 }
 0x62e   :  { %980 = verf.f32 %v638_v45  ;;  %v639_v47 = vmul.f32 0.70710677, %v633_v46  ;;  %v637_v55 = vmul.f32 0.5, %v633_v46 }
 0x630   :  { %982 = verf.f32 %v639_v47 }
 0x638   :  { %v981_v50 = vpop.eup %980 }
 0x639   :  { %v642_v51 = vadd.f32 1.0, %v981_v50 }
 0x63a   :  { %v983_v53 = vpop.eup %982 }
 0x63b   :  { %v643_v56 = vadd.f32 1.0, %v983_v53  ;;  %v644_v57 = vmul.f32 %v642_v51, %v636_v54 }
 0x63d   :  { %v645_v58 = vmul.f32 %v643_v56, %v637_v55 }
 0x63f   :  { %v646_v59 = vpack.c.bf16 %v645_v58, %v644_v57 }
 0x641   :  { %926 = vmatmul.mubr.bf16.vlgmr.msra.gmra.mrb[4].mxu0 %v646_v59 }
 0x714   :  { %v749_v7 = vpop.f32.mrb[4].mxu0 }
 0x715   :  { %v932_v8 = vadd.f32 %v931_v6, %v749_v7  ;;  %v927_v9 = vpop.f32.mrb[5].mxu0 }
 0x716   :  { %v752_v17 = vpop.f32.mrb[6].mxu0 }
 0x717   :  { %758 = vst.msk [vmem:[#allocation7] sm:$0xff] %vm72_vm0, %v932_v8  ;;  %v936_v0 = vadd.f32 %v935_v18, %v752_v17  ;;  %v928_v19 = vpop.f32.mrb[7].mxu0 }
 0x719   :  { %759 = vst.msk [vmem:[#allocation7 + $0x8] sm:$0xff] %vm72_vm0, %v936_v0 }
 0x71a   :  { %1039 = shalt.err (!%p1036_p6)
}
 0x71b   :  { %s1040_s24 = scalar_lea.hbm %s1400_s10, 256 }
 0x71c   :  { %p1041_p7 = scmp.ne.s32.totalorder %s1400_s10, %s1040_s24  ;;  %p1044_p8 = scmp.lt.u32.totalorder %s1040_s24, %s1400_s10 }
 0x71e   :  { %p1046_p9 = pnand %p1044_p8, %p1041_p7 }
 0x720   :  { %1049 = shalt.err (!%p1046_p9)
}
 0x721   :  { %s1065_s3 = smov 128   ;;  %s1066_s1 = smov 8  }
 0x722   :  { %771 = dma.vmem_to_hbm [thread:$0]  %s766_s0, 256, %s1400_s10, [#allocation4], %s1065_s3, %s1065_s3, %s1066_s1  }
 0x723   :  { %1054 = dma.done.wait [#allocation4], 256  }
 0x724   :  { %1055 = vsyncadd [#allocation4], 4294967040 }
 0x725   :  { %775 = vsyncpa [#allocation3], 1 }
 0x726   :  { %776 = vsyncpa [#allocation6], 1 }
 0x727   :  { %777 = vsyncpa [#allocation4], 1 }

</bundles_post_ra>
